<compile_context>
chip_gen: v7x
topology: tpu7x:2x2x1
jax: 0.10.0
libtpu: 0.0.40
codegen_flags: <defaults>
</compile_context>

<pallas_src>
import functools
import math

import jax
import jax.numpy as jnp
from jax.experimental import pallas as pl
from jax.experimental.pallas import tpu as pltpu


# ----------------------------------------------------------------------------
# Single fused kernel: both grouped linears in one invocation (no grid).
#   traj_ref : [R1, D1] f32      toff_ref : [R1, 1] i32  (= self label * E)
#   ws_ref   : [D1, W1] f32      bs_ref   : [1, W1] f32  (class-fused, padded)
#   nei_ref  : [R2, D2] f32      noff_ref : [R2, 1] i32  (= nei  label * E)
#   wn_ref   : [D2, W2] f32      bn_ref   : [1, W2] f32
# Outputs are class-fused, lane-dense slabs; only the E-wide group matching
# each row's label is non-zero (all-zero for label == -1).
# ----------------------------------------------------------------------------
def _encoder_kernel(traj_ref, toff_ref, ws_ref, bs_ref,
                    nei_ref, noff_ref, wn_ref, bn_ref,
                    xo_ref, no_ref, *, embed):
    # ---- self-trajectory embedding -------------------------------------
    t = traj_ref[...]                                            # [R1, D1]
    full_s = jnp.dot(t, ws_ref[...],
                     preferred_element_type=jnp.float32) + bs_ref[...]
    lanes_s = jax.lax.broadcasted_iota(jnp.int32, full_s.shape, 1)
    off_s = toff_ref[...]                                        # [R1, 1]
    mask_s = (lanes_s >= off_s) & (lanes_s < off_s + embed)
    xo_ref[...] = jnp.where(mask_s, full_s, 0.0)

    # ---- neighbour embedding (reciprocal preprocess, done once) --------
    v = nei_ref[...]                                             # [R2, D2]
    # torch: positive -> 1/(x + 1e-4) ; negative -> 1/(x - 1e-4)
    eps = jnp.where(v >= 0.0, 1e-4, -1e-4)
    v = pl.reciprocal(v + eps, approx=False)
    full_n = jnp.dot(v, wn_ref[...],
                     preferred_element_type=jnp.float32) + bn_ref[...]
    lanes_n = jax.lax.broadcasted_iota(jnp.int32, full_n.shape, 1)
    off_n = noff_ref[...]                                        # [R2, 1]
    mask_n = (lanes_n >= off_n) & (lanes_n < off_n + embed)
    no_ref[...] = jnp.where(mask_n, full_n, 0.0)


def _fuse_classes(W, b):
    """[C, D, E], [C, 1, E] -> [D, C*E], [1, C*E], zero-padded to 128 lanes."""
    C, D, E = W.shape
    Wf = W.transpose(1, 0, 2).reshape(D, C * E)
    bf = b.reshape(1, C * E)
    pad = (-Wf.shape[1]) % 128
    if pad:
        Wf = jnp.pad(Wf, ((0, 0), (0, pad)))
        bf = jnp.pad(bf, ((0, 0), (0, pad)))
    return Wf, bf


# ----------------------------------------------------------------------------
# Encoder forward (glue in plain JAX, compute in the single Pallas kernel).
# ----------------------------------------------------------------------------
def encoder_forward(params, obs, neis, self_labels, nei_labels, init_trajs,
                    *, pred_single):
    B, obs_len, in_size = obs.shape
    N = neis.shape[1]
    E = params["W_self"].shape[-1]

    # gather class-conditioned init trajectories -> [B*K, (obs+pred)*in]
    it = init_trajs[self_labels]                               # [B, K, pred, in]
    K = it.shape[1]
    obs_rep = jnp.broadcast_to(obs[:, None], (B, K, obs_len, in_size))
    traj = jnp.concatenate([obs_rep, it], axis=-2).reshape(B * K, -1)

    if pred_single:
        traj_labels = jnp.zeros((B * K,), jnp.int32)           # one shared Linear
    else:
        traj_labels = jnp.repeat(self_labels.astype(jnp.int32), K)

    neis_flat = neis.reshape(B * N, -1)
    nei_lab = nei_labels.reshape(B * N).astype(jnp.int32)

    # class-fused, lane-dense weights / biases
    Wsf, bsf = _fuse_classes(params["W_self"], params["b_self"])
    Wnf, bnf = _fuse_classes(params["W_nei"], params["b_nei"])

    # per-row lane offsets (label * E).  label == -1 -> offset -E -> empty mask.
    toff = (traj_labels * E).reshape(-1, 1).astype(jnp.int32)
    noff = (nei_lab * E).reshape(-1, 1).astype(jnp.int32)

    R1, W1 = traj.shape[0], Wsf.shape[1]
    R2, W2 = neis_flat.shape[0], Wnf.shape[1]

    vmem = pl.BlockSpec(memory_space=pltpu.MemorySpace.VMEM)
    xo, no = pl.pallas_call(
        functools.partial(_encoder_kernel, embed=E),
        out_shape=(jax.ShapeDtypeStruct((R1, W1), jnp.float32),
                   jax.ShapeDtypeStruct((R2, W2), jnp.float32)),
        in_specs=[vmem] * 8,
        out_specs=(vmem, vmem),
    )(traj, toff, Wsf, bsf, neis_flat, noff, Wnf, bnf)

    # Exactly one E-wide group per row is non-zero (or none for label == -1):
    # collapsing the class groups is layout plumbing, not compute.
    x = xo.reshape(R1, W1 // E, E).sum(axis=1).reshape(B, K, E)
    nei_feats = no.reshape(R2, W2 // E, E).sum(axis=1).reshape(B, N, E)
    return x, nei_feats


# ----------------------------------------------------------------------------
# Pure-JAX reference (mirrors the PyTorch forward) for verification.
# ----------------------------------------------------------------------------
def reference_forward(params, obs, neis, self_labels, nei_labels, init_trajs,
                      *, pred_single, num_class):
    B, obs_len, in_size = obs.shape
    N = neis.shape[1]
    E = params["W_self"].shape[-1]
    hp = jax.lax.Precision.HIGHEST

    it = init_trajs[self_labels]
    K = it.shape[1]
    obs_rep = jnp.broadcast_to(obs[:, None], (B, K, obs_len, in_size))
    traj = jnp.concatenate([obs_rep, it], axis=-2).reshape(B, K, -1)

    if pred_single:
        x = jnp.einsum("bkd,de->bke", traj, params["W_self"][0], precision=hp) \
            + params["b_self"][0, 0]
    else:
        w_sel = params["W_self"][self_labels]                  # [B, D1, E]
        b_sel = params["b_self"][self_labels]                  # [B, 1, E]
        x = jnp.einsum("bkd,bde->bke", traj, w_sel, precision=hp) + b_sel

    neis_r = neis.reshape(B, N, -1)
    v = jnp.where(neis_r >= 0.0, 1.0 / (neis_r + 1e-4), 1.0 / (neis_r - 1e-4))
    nei_feats = jnp.zeros((B, N, E), jnp.float32)
    for i in range(num_class + 1):
        out_i = jnp.einsum("bnd,de->bne", v, params["W_nei"][i], precision=hp) \
                + params["b_nei"][i, 0]
        nei_feats = jnp.where((nei_labels == i)[..., None], out_i, nei_feats)
    return x, nei_feats


# ----------------------------------------------------------------------------
def make_params(key, num_class, in_size, obs_len, pred_len, embed_size,
                pred_single):
    D1 = in_size * (obs_len + pred_len)
    D2 = in_size * obs_len
    C_self = 1 if pred_single else num_class
    C_nei = num_class + 1
    k1, k2, k3, k4 = jax.random.split(key, 4)
    b1 = 1.0 / math.sqrt(D1)
    b2 = 1.0 / math.sqrt(D2)
    return {
        # stored pre-transposed as [C, in, out] so the kernel does x @ W + b
        "W_self": jax.random.uniform(k1, (C_self, D1, embed_size),
                                     jnp.float32, -b1, b1),
        "b_self": jax.random.uniform(k2, (C_self, 1, embed_size),
                                     jnp.float32, -b1, b1),
        "W_nei": jax.random.uniform(k3, (C_nei, D2, embed_size),
                                    jnp.float32, -b2, b2),
        "b_nei": jax.random.uniform(k4, (C_nei, 1, embed_size),
                                    jnp.float32, -b2, b2),
    }


if __name__ == "__main__":
    num_class, in_size, obs_len, pred_len, embed_size = 3, 2, 8, 12, 32
    B, N, num_init_trajs = 4, 5, 6

    root = jax.random.PRNGKey(0)
    kp, ko, kn, ks, kl, ki = jax.random.split(root, 6)

    obs = jax.random.normal(ko, (B, obs_len, in_size), jnp.float32)
    # keep neighbour coords away from 0 so 1/(x±1e-4) stays well-conditioned
    r = jax.random.normal(kn, (B, N, obs_len, in_size), jnp.float32)
    neis = jnp.where(r >= 0.0, r + 0.5, r - 0.5)
    self_labels = jax.random.randint(ks, (B,), 0, num_class, jnp.int32)
    # nei labels may include -1 (unlabeled) -> those rows stay zero, as in torch
    nei_labels = jax.random.randint(kl, (B, N), -1, num_class + 1, jnp.int32)
    init_trajs = jax.random.normal(
        ki, (num_class, num_init_trajs, pred_len, in_size), jnp.float32)

    for pred_single in (False, True):
        params = make_params(kp, num_class, in_size, obs_len, pred_len,
                             embed_size, pred_single)
        x, nei_feats = jax.block_until_ready(
            encoder_forward(params, obs, neis, self_labels, nei_labels,
                            init_trajs, pred_single=pred_single))
        x_ref, nf_ref = reference_forward(params, obs, neis, self_labels,
                                          nei_labels, init_trajs,
                                          pred_single=pred_single,
                                          num_class=num_class)
        assert x.shape == (B, num_init_trajs, embed_size)
        assert nei_feats.shape == (B, N, embed_size)
        assert jnp.allclose(x, x_ref, rtol=2e-3, atol=2e-3)
        assert jnp.allclose(nei_feats, nf_ref, rtol=2e-3, atol=2e-3)

    print("KERNEL_OK")
</pallas_src>

<mosaic_0001>
module attributes {stable_mosaic.version = 11 : i64} {
  func.func @_encoder_kernel(%arg0: memref<24x40xf32, #tpu.memory_space<vmem>>, %arg1: memref<24x1xi32, #tpu.memory_space<vmem>>, %arg2: memref<40x128xf32, #tpu.memory_space<vmem>>, %arg3: memref<1x128xf32, #tpu.memory_space<vmem>>, %arg4: memref<20x16xf32, #tpu.memory_space<vmem>>, %arg5: memref<20x1xi32, #tpu.memory_space<vmem>>, %arg6: memref<16x128xf32, #tpu.memory_space<vmem>>, %arg7: memref<1x128xf32, #tpu.memory_space<vmem>>, %arg8: memref<24x128xf32, #tpu.memory_space<vmem>>, %arg9: memref<20x128xf32, #tpu.memory_space<vmem>>) attributes {dimension_semantics = [], scalar_prefetch = 0 : i64, scratch_operands = 0 : i64, tpu.core_type = #tpu.core_type<tc>} {
    %c0 = arith.constant 0 : index
    %c0_0 = arith.constant 0 : index
    %0 = vector.load %arg0[%c0, %c0_0] : memref<24x40xf32, #tpu.memory_space<vmem>>, vector<24x40xf32>
    %c0_1 = arith.constant 0 : index
    %c0_2 = arith.constant 0 : index
    %1 = vector.load %arg2[%c0_1, %c0_2] : memref<40x128xf32, #tpu.memory_space<vmem>>, vector<40x128xf32>
    %cst = arith.constant dense<0.000000e+00> : vector<24x128xf32>
    %2 = tpu.matmul %0, %1, %cst {dimension_numbers = #tpu.dot_dimension_numbers<[1], [0], [0], [1], [0, 0, 1, 1], [], []>} : vector<24x40xf32>, vector<40x128xf32>, vector<24x128xf32> -> vector<24x128xf32>
    %c0_3 = arith.constant 0 : index
    %c0_4 = arith.constant 0 : index
    %3 = vector.load %arg3[%c0_3, %c0_4] : memref<1x128xf32, #tpu.memory_space<vmem>>, vector<1x128xf32>
    %4 = vector.broadcast %3 : vector<1x128xf32> to vector<24x128xf32>
    %5 = arith.addf %2, %4 : vector<24x128xf32>
    %6 = tpu.iota {dimensions = array<i32: 1>} : vector<24x128xi32>
    %c0_5 = arith.constant 0 : index
    %c0_6 = arith.constant 0 : index
    %7 = vector.load %arg1[%c0_5, %c0_6] : memref<24x1xi32, #tpu.memory_space<vmem>>, vector<24x1xi32>
    %8 = vector.broadcast %7 : vector<24x1xi32> to vector<24x128xi32>
    %9 = arith.cmpi sge, %6, %8 : vector<24x128xi32>
    %c32_i32 = arith.constant 32 : i32
    %10 = vector.broadcast %c32_i32 : i32 to vector<24x1xi32>
    %11 = arith.addi %7, %10 : vector<24x1xi32>
    %12 = vector.broadcast %11 : vector<24x1xi32> to vector<24x128xi32>
    %13 = arith.cmpi slt, %6, %12 : vector<24x128xi32>
    %14 = arith.andi %9, %13 : vector<24x128xi1>
    %cst_7 = arith.constant 0.000000e+00 : f32
    %15 = vector.broadcast %cst_7 : f32 to vector<24x128xf32>
    %16 = arith.select %14, %5, %15 : vector<24x128xi1>, vector<24x128xf32>
    %c0_8 = arith.constant 0 : index
    %c0_9 = arith.constant 0 : index
    %17 = vector.load %arg8[%c0_8, %c0_9] : memref<24x128xf32, #tpu.memory_space<vmem>>, vector<24x128xf32>
    tpu.vector_store %arg8[%c0_8, %c0_9], %16 {strides = array<i32>} : memref<24x128xf32, #tpu.memory_space<vmem>>, vector<24x128xf32>,
    %c0_10 = arith.constant 0 : index
    %c0_11 = arith.constant 0 : index
    %18 = vector.load %arg4[%c0_10, %c0_11] : memref<20x16xf32, #tpu.memory_space<vmem>>, vector<20x16xf32>
    %cst_12 = arith.constant 0.000000e+00 : f32
    %19 = vector.broadcast %cst_12 : f32 to vector<20x16xf32>
    %20 = arith.cmpf oge, %18, %19 : vector<20x16xf32>
    %cst_13 = arith.constant 9.99999974E-5 : f32
    %cst_14 = arith.constant -9.99999974E-5 : f32
    %21 = vector.broadcast %cst_13 : f32 to vector<20x16xf32>
    %22 = vector.broadcast %cst_14 : f32 to vector<20x16xf32>
    %23 = arith.select %20, %21, %22 : vector<20x16xi1>, vector<20x16xf32>
    %24 = arith.addf %18, %23 : vector<20x16xf32>
    %25 = tpu.reciprocal %24 : vector<20x16xf32> -> vector<20x16xf32>
    %c0_15 = arith.constant 0 : index
    %c0_16 = arith.constant 0 : index
    %26 = vector.load %arg6[%c0_15, %c0_16] : memref<16x128xf32, #tpu.memory_space<vmem>>, vector<16x128xf32>
    %cst_17 = arith.constant dense<0.000000e+00> : vector<20x128xf32>
    %27 = tpu.matmul %25, %26, %cst_17 {dimension_numbers = #tpu.dot_dimension_numbers<[1], [0], [0], [1], [0, 0, 1, 1], [], []>} : vector<20x16xf32>, vector<16x128xf32>, vector<20x128xf32> -> vector<20x128xf32>
    %c0_18 = arith.constant 0 : index
    %c0_19 = arith.constant 0 : index
    %28 = vector.load %arg7[%c0_18, %c0_19] : memref<1x128xf32, #tpu.memory_space<vmem>>, vector<1x128xf32>
    %29 = vector.broadcast %28 : vector<1x128xf32> to vector<20x128xf32>
    %30 = arith.addf %27, %29 : vector<20x128xf32>
    %31 = tpu.iota {dimensions = array<i32: 1>} : vector<20x128xi32>
    %c0_20 = arith.constant 0 : index
    %c0_21 = arith.constant 0 : index
    %32 = vector.load %arg5[%c0_20, %c0_21] : memref<20x1xi32, #tpu.memory_space<vmem>>, vector<20x1xi32>
    %33 = vector.broadcast %32 : vector<20x1xi32> to vector<20x128xi32>
    %34 = arith.cmpi sge, %31, %33 : vector<20x128xi32>
    %c32_i32_22 = arith.constant 32 : i32
    %35 = vector.broadcast %c32_i32_22 : i32 to vector<20x1xi32>
    %36 = arith.addi %32, %35 : vector<20x1xi32>
    %37 = vector.broadcast %36 : vector<20x1xi32> to vector<20x128xi32>
    %38 = arith.cmpi slt, %31, %37 : vector<20x128xi32>
    %39 = arith.andi %34, %38 : vector<20x128xi1>
    %cst_23 = arith.constant 0.000000e+00 : f32
    %40 = vector.broadcast %cst_23 : f32 to vector<20x128xf32>
    %41 = arith.select %39, %30, %40 : vector<20x128xi1>, vector<20x128xf32>
    %c0_24 = arith.constant 0 : index
    %c0_25 = arith.constant 0 : index
    %42 = vector.load %arg9[%c0_24, %c0_25] : memref<20x128xf32, #tpu.memory_space<vmem>>, vector<20x128xf32>
    tpu.vector_store %arg9[%c0_24, %c0_25], %41 {strides = array<i32>} : memref<20x128xf32, #tpu.memory_space<vmem>>, vector<20x128xf32>,
    return
  }
}

</mosaic_0001>

<bundles_post_ra>
// kernel: tpu_custom_call.1
= control target key start
LH: loop header
LB: loop body
LE: loop exit
PB: predicated region body
PF: predicated region fallthrough
CT: control target
= control target key end

     0   :  { %15 = vsyncpa [#allocation3], 0  ;;  %v491_v3 = vmov 0.0|0.0   ;;  %vm492_vm0 = vmmov 0   ;;  %v493_v6 = vmov 0.0   ;;  %v494_v13 = vmov 0   ;;  %s692_s0 = inlined_call_operand.vmem [shape: f32[24,40], index: 0, kind: input, shape index: {}]   ;;  %s693_s1 = inlined_call_operand.vmem [shape: s32[24,1], index: 1, kind: input, shape index: {}]   ;;  %s694_s2 = inlined_call_operand.vmem [shape: f32[40,128], index: 2, kind: input, shape index: {}]   ;;  %s695_s3 = inlined_call_operand.vmem [shape: f32[1,128], index: 3, kind: input, shape index: {}]   ;;  %s696_s4 = inlined_call_operand.vmem [shape: f32[20,16], index: 4, kind: input, shape index: {}]   ;;  %s697_s5 = inlined_call_operand.vmem [shape: s32[20,1], index: 5, kind: input, shape index: {}]   ;;  %s698_s6 = inlined_call_operand.vmem [shape: f32[16,128], index: 6, kind: input, shape index: {}]   ;;  %s699_s7 = inlined_call_operand.vmem [shape: f32[1,128], index: 7, kind: input, shape index: {}]   ;;  %s700_s8 = inlined_call_operand.hbm [shape: f32[24,128], index: 8, kind: output, shape index: {0}]   ;;  %s701_s9 = inlined_call_operand.hbm [shape: f32[20,128], index: 9, kind: output, shape index: {1}]  }
   0x1   :  { %v36_v0 = vld [vmem:[%s694_s2] sm:$0xff]  ;;  %v37_v1 = vld [vmem:[%s694_s2 + $0x8] sm:$0xff]  ;;  %v38_v2 = vld [vmem:[%s694_s2 + $0x10] sm:$0xff]  ;;  %417 = vmatprep.subr.bf16.mxu0 %v491_v3  ;;  %395 = vmatprep.mubr.msk.f32.mxu0 %vm492_vm0, %v493_v6  ;;  %v495_v17 = vmov -0.0001  }
   0x2   :  { %v418_v4 = vpack.c.bf16 %v37_v1, %v36_v0  ;;  %v39_v5 = vld [vmem:[%s694_s2 + $0x18] sm:$0xff]  ;;  %423 = vmatprep.subr.bf16.mxu1 %v491_v3  ;;  %v194_v7 = vld [vmem:[%s698_s6] sm:$0xff]  ;;  %v195_v8 = vld [vmem:[%s698_s6 + $0x8] sm:$0xff]  ;;  %408 = vmatprep.mubr.msk.f32.mxu1 %vm492_vm0, %v493_v6 }
   0x3   :  { %v421_v9 = vpack.c.bf16 %v39_v5, %v38_v2  ;;  %v424_v10 = vpack.c.bf16 %v195_v8, %v194_v7  ;;  %v179_v11 = vld [vmem:[%s696_s4] sm:$0xff]  ;;  %v180_v12 = vld [vmem:[%s696_s4 + $0x8] sm:$0xff]  ;;  %436 = vset.pattern.permute.xlu1 %v494_v13  ;;  %v181_v14 = vld [vmem:[%s696_s4 + $0x10] sm:$0xf]  ;;  %435 = vset.pattern.permute.xlu0 %v494_v13 }
   0x4   :  { %419 = vmatpush3.bf16.msra.mxu0 %v418_v4  ;;  %vm182_vm1 = vcmp.ge.f32.partialorder %v179_v11, 0.0  ;;  %vm183_vm2 = vcmp.ge.f32.partialorder %v180_v12, 0.0  ;;  %v142_v15 = vld [vmem:[%s693_s1 + $0x10] sm:$0xff]  ;;  %v140_v16 = vld [vmem:[%s693_s1] sm:$0xff]  ;;  %vm184_vm3 = vcmp.ge.f32.partialorder %v181_v14, 0.0  ;;  %v141_v24 = vld [vmem:[%s693_s1 + $0x8] sm:$0xff] }
   0x5   :  { %420 = vmatprep.subr.bf16.mxu0 %v491_v3  ;;  %425 = vmatpush3.bf16.msra.mxu1 %v424_v10  ;;  %v185_v18 = vsel %vm182_vm1, 0.0001, %v495_v17  ;;  %v186_v19 = vsel %vm183_vm2, 0.0001, %v495_v17  ;;  %v155_v22 = vadd.s32 32, %v140_v16  ;;  %v40_v25 = vld [vmem:[%s694_s2 + $0x20] sm:$0xff] }
   0x6   :  { %150 = vperm.xlu1 %436, %v142_v15   ;;  %v188_v20 = vadd.f32 %v185_v18, %v179_v11  ;;  %v189_v21 = vadd.f32 %v186_v19, %v180_v12  ;;  %144 = vperm.xlu0 %435, %v140_v16   ;;  %v187_v23 = vsel %vm184_vm3, 0.0001, %v495_v17 }
   0x8   :  { %422 = vmatpush3.bf16.msra.mxu0 %v421_v9  ;;  %437 = vrcp.f32 %v188_v20 }
   0x9   :  { %393 = vmatprep.subr.mxu0 %v493_v6 }
   0xa   :  { %16 = vsyncpa [#allocation5], 0  ;;  %v33_v26 = vld [vmem:[%s692_s0] sm:$0xff]  ;;  %vm48_vm4 = vcmask 326656   ;;  %v157_v27 = vadd.s32 32, %v142_v15  ;;  %159 = vperm.xlu1 %436, %v155_v22   ;;  %439 = vrcp.f32 %v189_v21  ;;  %v190_v28 = vadd.f32 %v187_v23, %v181_v14  ;;  %147 = vperm.xlu0 %435, %v141_v24   ;;  %v34_v30 = vld [vmem:[%s692_s0 + $0x8] sm:$0xff] }
   0xb   :  { %v156_v29 = vadd.s32 32, %v141_v24  ;;  %v294_v31 = vld [vmem:[%s697_s5 + $0x8] sm:$0xff]  ;;  %v293_v32 = vld [vmem:[%s697_s5] sm:$0xff]  ;;  %vm203_vm5 = vcmask 130048   ;;  %v35_v33 = vld [vmem:[%s692_s0 + $0x10] sm:$0xff]  ;;  %v138_v46 = vlaneseq  ;;  %s496_s23 = smov [#allocation2]  }
   0xc   :  { %394 = vmatpush3.msra.mxu0 %v40_v25  ;;  %441 = vrcp.f32 %v190_v28  ;;  %v308_v34 = vadd.s32 32, %v293_v32  ;;  %v295_v36 = vld [vmem:[%s697_s5 + $0x10] sm:$0xf]  ;;  %v309_v39 = vadd.s32 32, %v294_v31  ;;  %v364_v50 = vld [vmem:[%s695_s3] ss:$0 sm:$0xff] }
   0xd   :  { %396 = vmatmul.mubr.msk.f32.vlgmr.msra.gmra.mrb[0].mxu0 %vm48_vm4, %v33_v26  ;;  %v310_v38 = vadd.s32 32, %v295_v36  ;;  %v626_v48 = vand.u32 127, %v138_v46  ;;  %v368_v60 = vld [vmem:[%s699_s7] ss:$0 sm:$0xff]  ;;  %s337_s24 = sshll.u32 %s496_s23, 4  ;;  %s644_s24 = int_to_ptr.vmem [resolvable:$true] %s337_s24 }
   0xe   :  { %398 = vmatprep.mubr.msk.f32.mxu0 %vm492_vm0, %v493_v6  ;;  %165 = vperm.xlu1 %436, %v157_v27   ;;  %s443_s7 = scalar_lea.vmem %s644_s24, 384  ;;  %p448_p1 = scmp.lt.s32.totalorder %s644_s24, %s644_s24 }
   0xf   :  { %162 = vperm.xlu0 %435, %v156_v29   ;;  %p444_p0 = scmp.ne.s32.totalorder %s644_s24, %s443_s7  ;;  %p449_p2 = scmp.lt.s32.totalorder %s443_s7, %s443_s7 }
  0x11   :  { %399 = vmatmul.mubr.msk.f32.gmra.mrb[2].mxu0 %vm48_vm4, %v34_v30  ;;  %p450_p3 = por %p449_p2, %p448_p1 }
  0x12   :  { %401 = vmatprep.mubr.msk.f32.mxu0 %vm492_vm0, %v493_v6  ;;  %300 = vperm.xlu1 %436, %v294_v31   ;;  %v438_v35 = vpop.eup %437 }
  0x13   :  { %297 = vperm.xlu0 %435, %v293_v32   ;;  %409 = vmatmul.mubr.msk.f32.vlgmr.msra.gmra.mrb[0].mxu1 %vm203_vm5, %v438_v35  ;;  %p451_p4 = pnand %p450_p3, %p444_p0 }
  0x14   :  { %v440_v37 = vpop.eup %439  ;;  %411 = vmatprep.mubr.msk.f32.mxu1 %vm492_vm0, %v493_v6 }
  0x15   :  { %402 = vmatmul.mubr.msk.f32.gmra.mrb[4].mxu0 %vm48_vm4, %v35_v33 }
  0x16   :  { %312 = vperm.xlu1 %436, %v308_v34   ;;  %v442_v40 = vpop.eup %441 }
  0x17   :  { %303 = vperm.xlu0 %435, %v295_v36   ;;  %412 = vmatmul.mubr.msk.f32.gmra.mrb[2].mxu1 %vm203_vm5, %v440_v37 }
  0x18   :  { %414 = vmatprep.mubr.msk.f32.mxu1 %vm492_vm0, %v493_v6 }
  0x1a   :  { %318 = vperm.xlu1 %436, %v310_v38  }
  0x1b   :  { %315 = vperm.xlu0 %435, %v309_v39   ;;  %415 = vmatmul.mubr.msk.f32.gmra.mrb[4].mxu1 %vm203_vm5, %v442_v40 }
  0x85   :  { %v145_v41 = vpop.permute.xlu0 %144  ;;  %v151_v42 = vpop.permute.xlu1 %150 }
  0x86   :  { %vm152_vm6 = vcmp.ge.s32.totalorder %v626_v48, %v145_v41  ;;  %vm154_vm14 = vcmp.ge.s32.totalorder %v626_v48, %v151_v42 }
  0x89   :  { %v148_v43 = vpop.permute.xlu0 %147  ;;  %v160_v44 = vpop.permute.xlu1 %159 }
  0x8a   :  { %vm167_vm7 = vcmp.lt.s32.totalorder %v626_v48, %v160_v44  ;;  %vm153_vm9 = vcmp.ge.s32.totalorder %v626_v48, %v148_v43 }
  0x8b   :  { %vm170_vm8 = vmand %vm152_vm6, %vm167_vm7 }
  0x8d   :  { %v166_v47 = vpop.permute.xlu1 %165 }
  0x8e   :  { %v163_v45 = vpop.permute.xlu0 %162  ;;  %vm169_vm15 = vcmp.lt.s32.totalorder %v626_v48, %v166_v47 }
  0x8f   :  { %vm168_vm10 = vcmp.lt.s32.totalorder %v626_v48, %v163_v45  ;;  %vm172_vm1 = vmand %vm154_vm14, %vm169_vm15 }
  0x90   :  { %vm171_vm11 = vmand %vm153_vm9, %vm168_vm10 }
  0x91   :  { %v301_v51 = vpop.permute.xlu1 %300 }
  0x92   :  { %v298_v49 = vpop.permute.xlu0 %297  ;;  %vm306_vm2 = vcmp.ge.s32.totalorder %v626_v48, %v301_v51 }
  0x93   :  { %vm305_vm12 = vcmp.ge.s32.totalorder %v626_v48, %v298_v49 }
  0x95   :  { %v313_v58 = vpop.permute.xlu1 %312 }
  0x96   :  { %v633_v53 = vpop.permute.xlu0 %303  ;;  %vm320_vm13 = vcmp.lt.s32.totalorder %v626_v48, %v313_v58 }
  0x97   :  { %vm323_vm0 = vmand %vm305_vm12, %vm320_vm13 }
  0x99   :  { %v319_v7 = vpop.permute.xlu1 %318 }
  0x9a   :  { %v316_v62 = vpop.permute.xlu0 %315 }
  0x9b   :  { %vm321_vm3 = vcmp.lt.s32.totalorder %v626_v48, %v316_v62 }
  0x9c   :  { %vm648_vm4 = vmand %vm306_vm2, %vm321_vm3 }
  0xe0   :  { %v124_v52 = vpop.f32.mrb[0].mxu0 }
  0xe1   :  { %v125_v54 = vadd.f32 %v364_v50, %v124_v52  ;;  %v397_v55 = vpop.f32.mrb[1].mxu0 }
  0xe3   :  { %v173_v56 = vsel %vm170_vm8, %v125_v54, 0.0 }
  0xe4   :  { %176 = vst [vmem:[#allocation2] sm:$0xff] %v173_v56  ;;  %v129_v57 = vpop.f32.mrb[2].mxu0 }
  0xe5   :  { %v130_v59 = vadd.f32 %v364_v50, %v129_v57  ;;  %v400_v61 = vpop.f32.mrb[3].mxu0 }
  0xe6   :  { %v279_v0 = vpop.f32.mrb[0].mxu1 }
  0xe7   :  { %v174_v63 = vsel %vm171_vm11, %v130_v59, 0.0  ;;  %v280_v1 = vadd.f32 %v368_v60, %v279_v0  ;;  %v410_v2 = vpop.f32.mrb[1].mxu1 }
  0xe8   :  { %177 = vst [vmem:[#allocation2 + $0x8] sm:$0xff] %v174_v63  ;;  %v134_v3 = vpop.f32.mrb[4].mxu0 }
  0xe9   :  { %v135_v4 = vadd.f32 %v364_v50, %v134_v3  ;;  %v403_v5 = vpop.f32.mrb[5].mxu0  ;;  %v326_v6 = vsel %vm323_vm0, %v280_v1, 0.0 }
  0xea   :  { %329 = vst [vmem:[#allocation4] sm:$0xff] %v326_v6  ;;  %v284_v9 = vpop.f32.mrb[2].mxu1 }
  0xeb   :  { %v175_v8 = vsel %vm172_vm1, %v135_v4, 0.0  ;;  %v285_v10 = vadd.f32 %v368_v60, %v284_v9  ;;  %v413_v11 = vpop.f32.mrb[3].mxu1 }
  0xec   :  { %178 = vst [vmem:[#allocation2 + $0x10] sm:$0xff] %v175_v8 }
  0xed   :  { %454 = shalt.err (!%p451_p4)
}
  0xee   :  { %s455_s26 = scalar_lea.hbm %s700_s8, 384 }
  0xef   :  { %p456_p5 = scmp.ne.s32.totalorder %s700_s8, %s455_s26  ;;  %p459_p6 = scmp.lt.u32.totalorder %s455_s26, %s700_s8 }
  0xf1   :  { %p461_p7 = pnand %p459_p6, %p456_p5 }
  0xf3   :  { %464 = shalt.err (!%p461_p7)
}
  0xf4   :  { %s497_s30 = smov 128   ;;  %s498_s10 = smov 8   ;;  %vm307_vm5 = vcmp.ge.s32.totalorder %v626_v48, %v633_v53  ;;  %vm322_vm6 = vcmp.lt.s32.totalorder %v626_v48, %v319_v7  ;;  %v327_v13 = vsel %vm648_vm4, %v285_v10, 0.0  ;;  %v289_v14 = vpop.f32.mrb[4].mxu1 }
  0xf5   :  { %343 = dma.vmem_to_hbm [thread:$0]  %s644_s24, 384, %s700_s8, [#allocation3], %s497_s30, %s497_s30, %s498_s10   ;;  %330 = vst [vmem:[#allocation4 + $0x8] sm:$0xff] %v327_v13  ;;  %v290_v15 = vadd.f32 %v368_v60, %v289_v14  ;;  %v416_v16 = vpop.f32.mrb[5].mxu1  ;;  %vm325_vm7 = vmand %vm307_vm5, %vm322_vm6 }
  0xf6   :  { %s499_s13 = smov [#allocation4]  }
  0xf7   :  { %s349_s1 = sshll.u32 %s499_s13, 4  ;;  %v328_v17 = vsel %vm325_vm7, %v290_v15, 0.0  ;;  %s350_s1 = int_to_ptr.vmem [resolvable:$true] %s349_s1 }
  0xf8   :  { %331 = vst [vmem:[#allocation4 + $0x10] sm:$0xf] %v328_v17  ;;  %s465_s2 = scalar_lea.vmem %s350_s1, 384  ;;  %p470_p9 = scmp.lt.s32.totalorder %s350_s1, %s350_s1 }
  0xf9   :  { %p466_p8 = scmp.ne.s32.totalorder %s350_s1, %s465_s2  ;;  %p471_p10 = scmp.lt.s32.totalorder %s465_s2, %s465_s2 }
  0xfb   :  { %p472_p11 = por %p471_p10, %p470_p9 }
  0xfd   :  { %p473_p12 = pnand %p472_p11, %p466_p8 }
  0xff   :  { %476 = shalt.err (!%p473_p12)
}
 0x100   :  { %s477_s15 = scalar_lea.hbm %s701_s9, 384 }
 0x101   :  { %p478_p13 = scmp.ne.s32.totalorder %s701_s9, %s477_s15  ;;  %p481_p0 = scmp.lt.u32.totalorder %s477_s15, %s701_s9 }
 0x103   :  { %p483_p1 = pnand %p481_p0, %p478_p13 }
 0x105   :  { %486 = shalt.err (!%p483_p1)
}
 0x106   :  { %355 = dma.vmem_to_hbm [thread:$0]  %s350_s1, 384, %s701_s9, [#allocation5], %s497_s30, %s497_s30, %s498_s10  }
 0x107   :  { %487 = dma.done.wait [#allocation3], 384  }
 0x108   :  { %488 = vsyncadd [#allocation3], 4294966912 }
 0x109   :  { %489 = dma.done.wait [#allocation5], 384  }
 0x10a   :  { %490 = vsyncadd [#allocation5], 4294966912 }
 0x10b   :  { %362 = vsyncpa [#allocation3], 1 }
 0x10c   :  { %363 = vsyncpa [#allocation5], 1 }

</bundles_post_ra>
